<compile_context>
chip_gen: v5e
topology: v5e:2x2
jax: 0.10.0
libtpu: 0.0.40
codegen_flags: <defaults>
</compile_context>

<pallas_src>
import functools
import math

import jax
import jax.numpy as jnp
from jax.experimental import pallas as pl
from jax.experimental.pallas import tpu as pltpu

LANE = 128     # lane width of a vreg (last dim)
SUBLANE = 8    # sublane count of a vreg (second-to-last dim, f32)
TILE_B_MAX = 256  # batch tile per grid step (fits all of v5e/v6e/v7x comfortably)


def _round_up(x, m):
    return ((x + m - 1) // m) * m


# ----------------------------- Pallas kernel -------------------------------

def _fused_mlp_kernel(*refs, n_layers):
    """Fused MLP forward over one batch tile.

    refs = (x_ref, w0_ref, b0_ref, w1_ref, b1_ref, ..., o_ref).
    Hidden layers apply ReLU (Dropout is identity in eval mode); the final
    layer is plain affine.  Weight output dims are zero-padded to 128 lanes
    (zero cols + zero bias entries), so padded activation columns stay exactly
    zero through every layer.  Weights are bf16; the matmul accumulates in f32
    and the bias add / ReLU epilogue runs in f32 on the VPU.
    """
    x_ref = refs[0]
    o_ref = refs[-1]
    h = x_ref[...].astype(jnp.float32)
    for i in range(n_layers):
        w_ref = refs[1 + 2 * i]
        b_ref = refs[2 + 2 * i]
        y = jnp.dot(h.astype(w_ref.dtype), w_ref[...],
                    preferred_element_type=jnp.float32)
        y = y + b_ref[...].astype(jnp.float32)
        if i < n_layers - 1:
            y = jnp.maximum(y, 0.0)  # ReLU; Dropout(p) -> identity in eval mode
        h = y
    o_ref[...] = h.astype(o_ref.dtype)


# ------------------------------- wrappers -----------------------------------

def mlp_prob_forward(x, padded_params, *, output_dim, tile_b_max=TILE_B_MAX):
    """Fused Pallas forward. Returns (mean, log_var), each (B, output_dim).

    x:             (B, Fin)  unpadded input (f32).
    padded_params: list of (w_p, b_p) from pad_params():
                   w_p bf16 (Fin_or_prev_out_padded, Fout_p), b_p f32 (1, Fout_p).
    """
    B, Fin = x.shape
    dtype = x.dtype
    n_layers = len(padded_params)
    fout_last_p = padded_params[-1][0].shape[1]

    # Batch tiling: tile <= TILE_B_MAX, batch rounded up to a multiple of the tile.
    bp8 = _round_up(max(B, 1), SUBLANE)
    tile_b = min(tile_b_max, bp8)
    Bp = _round_up(B, tile_b)
    if Bp != B:
        # Zero rows flow through harmlessly and are sliced off below.
        x = jnp.pad(x, ((0, Bp - B), (0, 0)))
    grid = (Bp // tile_b,)

    inputs = [x]
    in_specs = [pl.BlockSpec((tile_b, Fin), lambda i: (i, 0))]
    flops = 0
    bytes_accessed = Bp * Fin * x.dtype.itemsize
    weight_bytes = 0
    max_width = fout_last_p
    for (w_p, b_p) in padded_params:
        inputs += [w_p, b_p]
        # Weights / biases: constant block index -> DMA'd once, VMEM-resident
        # across all batch-grid steps.
        in_specs += [
            pl.BlockSpec(w_p.shape, lambda i: (0, 0)),
            pl.BlockSpec(b_p.shape, lambda i: (0, 0)),
        ]
        flops += 2 * Bp * w_p.shape[0] * w_p.shape[1]
        weight_bytes += int(w_p.size) * w_p.dtype.itemsize
        weight_bytes += int(b_p.size) * b_p.dtype.itemsize
        max_width = max(max_width, w_p.shape[1])
    bytes_accessed += weight_bytes + Bp * fout_last_p * dtype.itemsize

    # VMEM budget: resident weights + double-buffered activation/output tiles
    # + live f32 intermediates, with headroom; capped at the v7x 64 MiB budget.
    act_bytes = tile_b * (Fin + 3 * max_width) * 4
    vmem_limit = int(min(64 * 1024 * 1024,
                         2 * (weight_bytes + 2 * act_bytes) + (4 << 20)))

    kernel = functools.partial(_fused_mlp_kernel, n_layers=n_layers)

    out_p = pl.pallas_call(
        kernel,
        out_shape=jax.ShapeDtypeStruct((Bp, fout_last_p), dtype),
        grid=grid,
        in_specs=in_specs,
        out_specs=pl.BlockSpec((tile_b, fout_last_p), lambda i: (i, 0)),
        compiler_params=pltpu.CompilerParams(
            dimension_semantics=("parallel",),   # v7x megacore sharding; no-op on v5e/v6e
            vmem_limit_bytes=vmem_limit,
        ),
        cost_estimate=pl.CostEstimate(
            flops=int(flops), transcendentals=0, bytes_accessed=int(bytes_accessed)),
    )(*inputs)

    # Un-pad and chunk in the wrapper: lane-dense kernel output, free slicing here.
    out = out_p[:B, : 2 * output_dim]
    mean = out[:, :output_dim]
    log_var = out[:, output_dim:]
    return mean, log_var


# --------------------------- parameter construction -------------------------

def init_mlp_prob_params(layer_sizes, key):
    """Deterministic params matching nn.Linear default init (U(-k, k), k=1/sqrt(fan_in)).

    Weights are stored transposed relative to PyTorch: (in_features, out_features),
    so the kernel computes x @ W directly.
    """
    params = []
    dims = list(layer_sizes[:-1]) + [layer_sizes[-1] * 2]  # last layer doubles out dim
    for i in range(len(dims) - 1):
        fan_in, fan_out = dims[i], dims[i + 1]
        key, kw, kb = jax.random.split(key, 3)
        bound = 1.0 / math.sqrt(fan_in)
        w = jax.random.uniform(kw, (fan_in, fan_out), jnp.float32, -bound, bound)
        b = jax.random.uniform(kb, (1, fan_out), jnp.float32, -bound, bound)
        params.append((w, b))
    return params


def pad_params(params):
    """Prepare kernel-resident parameters.

    * Output feature dims are zero-padded to a multiple of 128 lanes so every
      matmul output / bias add / store is lane-dense.
    * The FIRST layer keeps its unpadded input dim (it multiplies the unpadded
      x directly); later layers pad their input dim to match the previous
      layer's padded output.
    * Weights are cast to bf16 (half the DMA bytes, native MXU path); biases
      stay f32 for the f32 VPU epilogue.
    Done once, outside the forward.
    """
    padded = []
    for li, (w, b) in enumerate(params):
        fin, fout = w.shape
        fin_p = fin if li == 0 else _round_up(fin, LANE)
        fout_p = _round_up(fout, LANE)
        w_p = jnp.pad(w, ((0, fin_p - fin), (0, fout_p - fout))).astype(jnp.bfloat16)
        b_p = jnp.pad(b, ((0, 0), (0, fout_p - fout)))  # f32
        padded.append((w_p, b_p))
    return padded


# pure-JAX reference for sanity checking (uses the unpadded f32 params)
def mlp_prob_forward_ref(x, params):
    h = x
    for (w, b) in params[:-1]:
        h = jnp.maximum(h @ w + b, 0.0)
    w_f, b_f = params[-1]
    out = h @ w_f + b_f
    d = out.shape[1] // 2
    return out[:, :d], out[:, d:]


if __name__ == "__main__":
    # layer_sizes = [input_dim, hidden_dim, output_dim]
    layer_sizes = [32, 64, 16]
    batch = 8

    key = jax.random.PRNGKey(0)
    key, kx = jax.random.split(key)
    x = jax.random.normal(kx, (batch, layer_sizes[0]), jnp.float32)

    params = init_mlp_prob_params(layer_sizes, key)
    padded = pad_params(params)

    fwd = jax.jit(functools.partial(mlp_prob_forward, output_dim=layer_sizes[-1]))
    mean, log_var = fwd(x, padded)
    jax.block_until_ready((mean, log_var))

    mean_ref, log_var_ref = mlp_prob_forward_ref(x, params)
    assert mean.shape == (batch, layer_sizes[-1])
    assert log_var.shape == (batch, layer_sizes[-1])
    # bf16 weights in the kernel vs f32 reference -> relaxed tolerance.
    assert jnp.allclose(mean, mean_ref, atol=2e-2, rtol=2e-2)
    assert jnp.allclose(log_var, log_var_ref, atol=2e-2, rtol=2e-2)

    print("KERNEL_OK")
</pallas_src>

<mosaic_0001>
module attributes {stable_mosaic.version = 11 : i64} {
  func.func @_fused_mlp_kernel(%arg0: i32, %arg1: memref<8x32xf32, #tpu.memory_space<vmem>>, %arg2: memref<32x128xbf16, #tpu.memory_space<vmem>>, %arg3: memref<1x128xf32, #tpu.memory_space<vmem>>, %arg4: memref<128x128xbf16, #tpu.memory_space<vmem>>, %arg5: memref<1x128xf32, #tpu.memory_space<vmem>>, %arg6: memref<8x128xf32, #tpu.memory_space<vmem>>) attributes {dimension_semantics = [#tpu.dimension_semantics<parallel>], iteration_bounds = array<i64: 1>, scalar_prefetch = 0 : i64, scratch_operands = 0 : i64, tpu.core_type = #tpu.core_type<tc>, window_params = [{transform_indices = @transform_0, window_bounds = array<i64: 8, 32>}, {pipeline_mode = #tpu.pipeline_mode<synchronous>, transform_indices = @transform_1, window_bounds = array<i64: 32, 128>}, {pipeline_mode = #tpu.pipeline_mode<synchronous>, transform_indices = @transform_2, window_bounds = array<i64: 1, 128>}, {pipeline_mode = #tpu.pipeline_mode<synchronous>, transform_indices = @transform_3, window_bounds = array<i64: 128, 128>}, {pipeline_mode = #tpu.pipeline_mode<synchronous>, transform_indices = @transform_4, window_bounds = array<i64: 1, 128>}, {transform_indices = @transform_5, window_bounds = array<i64: 8, 128>}]} {
    %c0 = arith.constant 0 : index
    %c0_0 = arith.constant 0 : index
    %0 = vector.load %arg1[%c0, %c0_0] : memref<8x32xf32, #tpu.memory_space<vmem>>, vector<8x32xf32>
    %1 = arith.truncf %0 : vector<8x32xf32> to vector<8x32xbf16>
    %c0_1 = arith.constant 0 : index
    %c0_2 = arith.constant 0 : index
    %2 = vector.load %arg2[%c0_1, %c0_2] : memref<32x128xbf16, #tpu.memory_space<vmem>>, vector<32x128xbf16>
    %cst = arith.constant dense<0.000000e+00> : vector<8x128xf32>
    %3 = tpu.matmul %1, %2, %cst {dimension_numbers = #tpu.dot_dimension_numbers<[1], [0], [0], [1], [0, 0, 1, 1], [], []>} : vector<8x32xbf16>, vector<32x128xbf16>, vector<8x128xf32> -> vector<8x128xf32>
    %c0_3 = arith.constant 0 : index
    %c0_4 = arith.constant 0 : index
    %4 = vector.load %arg3[%c0_3, %c0_4] : memref<1x128xf32, #tpu.memory_space<vmem>>, vector<1x128xf32>
    %5 = vector.broadcast %4 : vector<1x128xf32> to vector<8x128xf32>
    %6 = arith.addf %3, %5 : vector<8x128xf32>
    %cst_5 = arith.constant 0.000000e+00 : f32
    %7 = vector.broadcast %cst_5 : f32 to vector<8x128xf32>
    %8 = arith.maximumf %6, %7 : vector<8x128xf32>
    %9 = arith.truncf %8 : vector<8x128xf32> to vector<8x128xbf16>
    %c0_6 = arith.constant 0 : index
    %c0_7 = arith.constant 0 : index
    %10 = vector.load %arg4[%c0_6, %c0_7] : memref<128x128xbf16, #tpu.memory_space<vmem>>, vector<128x128xbf16>
    %cst_8 = arith.constant dense<0.000000e+00> : vector<8x128xf32>
    %11 = tpu.matmul %9, %10, %cst_8 {dimension_numbers = #tpu.dot_dimension_numbers<[1], [0], [0], [1], [0, 0, 1, 1], [], []>} : vector<8x128xbf16>, vector<128x128xbf16>, vector<8x128xf32> -> vector<8x128xf32>
    %c0_9 = arith.constant 0 : index
    %c0_10 = arith.constant 0 : index
    %12 = vector.load %arg5[%c0_9, %c0_10] : memref<1x128xf32, #tpu.memory_space<vmem>>, vector<1x128xf32>
    %13 = vector.broadcast %12 : vector<1x128xf32> to vector<8x128xf32>
    %14 = arith.addf %11, %13 : vector<8x128xf32>
    %c0_11 = arith.constant 0 : index
    %c0_12 = arith.constant 0 : index
    %15 = vector.load %arg6[%c0_11, %c0_12] : memref<8x128xf32, #tpu.memory_space<vmem>>, vector<8x128xf32>
    tpu.vector_store %arg6[%c0_11, %c0_12], %14 {strides = array<i32>} : memref<8x128xf32, #tpu.memory_space<vmem>>, vector<8x128xf32>,
    return
  }
  func.func @transform_0(%arg0: i32) -> (i32, i32) {
    %c0_i32 = arith.constant 0 : i32
    %c0_i32_0 = arith.constant 0 : i32
    return %arg0, %c0_i32 : i32, i32
  }
  func.func @transform_1(%arg0: i32) -> (i32, i32) {
    %c0_i32 = arith.constant 0 : i32
    %c0_i32_0 = arith.constant 0 : i32
    %c0_i32_1 = arith.constant 0 : i32
    return %c0_i32, %c0_i32_0 : i32, i32
  }
  func.func @transform_2(%arg0: i32) -> (i32, i32) {
    %c0_i32 = arith.constant 0 : i32
    %c0_i32_0 = arith.constant 0 : i32
    %c0_i32_1 = arith.constant 0 : i32
    return %c0_i32, %c0_i32_0 : i32, i32
  }
  func.func @transform_3(%arg0: i32) -> (i32, i32) {
    %c0_i32 = arith.constant 0 : i32
    %c0_i32_0 = arith.constant 0 : i32
    %c0_i32_1 = arith.constant 0 : i32
    return %c0_i32, %c0_i32_0 : i32, i32
  }
  func.func @transform_4(%arg0: i32) -> (i32, i32) {
    %c0_i32 = arith.constant 0 : i32
    %c0_i32_0 = arith.constant 0 : i32
    %c0_i32_1 = arith.constant 0 : i32
    return %c0_i32, %c0_i32_0 : i32, i32
  }
  func.func @transform_5(%arg0: i32) -> (i32, i32) {
    %c0_i32 = arith.constant 0 : i32
    %c0_i32_0 = arith.constant 0 : i32
    return %arg0, %c0_i32 : i32, i32
  }
}

</mosaic_0001>

<bundles_post_ra>
// kernel: mlp_prob_forward.1
= control target key start
LH: loop header
LB: loop body
LE: loop exit
PB: predicated region body
PF: predicated region fallthrough
CT: control target
= control target key end

     0   :  { %10 = vsyncpa [#allocation3], 0  ;;  %s382_s0 = inlined_call_operand.hbm [shape: f32[8,32], index: 0, kind: input, shape index: {}]   ;;  %s383_s1 = inlined_call_operand.hbm [shape: bf16[32,128], index: 1, kind: input, shape index: {}]   ;;  %s384_s2 = inlined_call_operand.vmem [shape: f32[1,128], index: 2, kind: input, shape index: {}]   ;;  %s385_s3 = inlined_call_operand.hbm [shape: bf16[128,128], index: 3, kind: input, shape index: {}]   ;;  %s386_s4 = inlined_call_operand.vmem [shape: f32[1,128], index: 4, kind: input, shape index: {}]   ;;  %s387_s5 = inlined_call_operand.vmem [shape: f32[8,128], index: 5, kind: output, shape index: {}]  }
   0x1   :  { %11 = vsyncpa [#allocation5], 0  ;;  %s27_s20 = sshll.u32 %s383_s1, 4  ;;  %s329_s21 = smov [#allocation4]   ;;  %s28_s20 = int_to_ptr.hbm [resolvable:$true] %s27_s20 }
   0x2   :  { %s29_s22 = sshll.u32 %s329_s21, 4  ;;  %s17_s25 = sshll.u32 %s382_s0, 4  ;;  %s30_s22 = int_to_ptr.vmem [resolvable:$true] %s29_s22  ;;  %s18_s25 = int_to_ptr.hbm [resolvable:$true] %s17_s25 }
   0x3   :  { %s330_s26 = smov 64   ;;  %s331_s27 = smov 4  }
   0x4   :  { %35 = dma.hbm_to_vmem [thread:$0]  %s28_s20, 256, %s30_s22, [#allocation5], %s330_s26, %s330_s26, %s331_s27  }
   0x5   :  { %s332_s28 = smov [#allocation2]   ;;  %s42_s7 = sshll.u32 %s385_s3, 4  ;;  %s43_s7 = int_to_ptr.hbm [resolvable:$true] %s42_s7 }
   0x6   :  { %s19_s29 = sshll.u32 %s332_s28, 4  ;;  %s333_s1 = smov [#allocation6]   ;;  %s20_s29 = int_to_ptr.vmem [resolvable:$true] %s19_s29 }
   0x7   :  { %22 = dma.hbm_to_vmem [thread:$0]  %s18_s25, 128, %s20_s29, [#allocation3]  }
   0x8   :  { %s44_s8 = sshll.u32 %s333_s1, 4  ;;  %s45_s8 = int_to_ptr.vmem [resolvable:$true] %s44_s8 }
   0x9   :  { %50 = dma.hbm_to_vmem [thread:$0]  %s43_s7, 1024, %s45_s8, [#allocation5], %s330_s26, %s330_s26, %s331_s27  }
   0xa   :  { %325 = dma.done.wait [#allocation3], 128  }
   0xb   :  { %326 = vsyncadd [#allocation3], 4294967168 }
   0xc   :  { %327 = dma.done.wait [#allocation5], 1280  }
   0xd   :  { %328 = vsyncadd [#allocation5], 4294966016  ;;  %v237_v0 = vld [vmem:[#allocation4 + $0x8] sm:$0xff]  ;;  %v236_v2 = vld [vmem:[#allocation4] sm:$0xff]  ;;  %vm88_vm0 = vcmask 261120  }
   0xe   :  { %v245_v1 = vld [vmem:[#allocation6 + $0x38] sm:$0xff]  ;;  %98 = vmatpush.bf16.msra.mxu0 %v237_v0  ;;  %v66_v3 = vld [vmem:[#allocation2] sm:$0xff]  ;;  %v244_v4 = vld [vmem:[#allocation6 + $0x30] sm:$0xff] }
   0xf   :  { %175 = vmatpush.bf16.msra.mxu1 %v245_v1  ;;  %v67_v5 = vpack.c.bf16 %v66_v3, %v66_v3  ;;  %v243_v6 = vld [vmem:[#allocation6 + $0x28] sm:$0xff]  ;;  %v242_v7 = vld [vmem:[#allocation6 + $0x20] sm:$0xff]  ;;  %v241_v8 = vld [vmem:[#allocation6 + $0x18] sm:$0xff] }
  0x10   :  { %v240_v9 = vld [vmem:[#allocation6 + $0x10] sm:$0xff]  ;;  %v239_v10 = vld [vmem:[#allocation6 + $0x8] sm:$0xff]  ;;  %v238_v11 = vld [vmem:[#allocation6] sm:$0xff] }
  0x11   :  { %v251_v12 = vld [vmem:[%s384_s2] ss:$0 sm:$0xff] }
  0x12   :  { %99 = vmatpush.bf16.msra.mxu0 %v236_v2  ;;  %v252_v18 = vld [vmem:[%s386_s4] ss:$0 sm:$0xff] }
  0x13   :  { %176 = vmatpush.bf16.msra.mxu1 %v244_v4 }
  0x15   :  { %203 = vmatmul.msk.bf16.vlgmr.msra.gmra.mxu0 %vm88_vm0, %v67_v5 }
  0x17   :  { %177 = vmatpush.bf16.msra.mxu1 %v243_v6 }
  0x1b   :  { %178 = vmatpush.bf16.msra.mxu1 %v242_v7 }
  0x1f   :  { %179 = vmatpush.bf16.msra.mxu1 %v241_v8 }
  0x23   :  { %180 = vmatpush.bf16.msra.mxu1 %v240_v9 }
  0x27   :  { %181 = vmatpush.bf16.msra.mxu1 %v239_v10 }
  0x2b   :  { %182 = vmatpush.bf16.msra.mxu1 %v238_v11 }
  0x92   :  { %v101_v13 = vpop.f32.mrf.mxu0 }
  0x93   :  { %v102_v14 = vadd.f32 %v251_v12, %v101_v13 }
  0x95   :  { %v105_v15 = vmax.f32 %v102_v14, 0.0 }
  0x97   :  { %v106_v16 = vpack.c.bf16 %v105_v15, %v105_v15 }
  0x99   :  { %183 = vmatmul.bf16.vlgmr.msra.gmra.mxu1 %v106_v16 }
  0x9a   :  { %v103_v17 = vpop.f32.mrf.mxu0 }
 0x116   :  { %v184_v19 = vpop.f32.mrf.mxu1 }
 0x117   :  { %v185_v20 = vadd.f32 %v252_v18, %v184_v19 }
 0x119   :  { %188 = vst [vmem:[%s387_s5] sm:$0xff] %v185_v20 }
 0x11e   :  { %v186_v21 = vpop.f32.mrf.mxu1 }
 0x11f   :  { %193 = vsyncpa [#allocation3], 1 }
 0x120   :  { %194 = vsyncpa [#allocation5], 1 }

</bundles_post_ra>
